<compile_context>
chip_gen: v7x
topology: tpu7x:2x2x1
jax: 0.10.0
libtpu: 0.0.40
codegen_flags: <defaults>
</compile_context>

<pallas_src>
import jax
import jax.numpy as jnp
from jax.experimental import pallas as pl
from jax.experimental.pallas import tpu as pltpu

# --- module "parameters" (deterministic, set in-script) -----------------
CUTOFF = 8.0
CUTOFF_SR = 4.0                    # cutoff_short_range != cutoff -> split branch
CUTOFF_SQ = CUTOFF * CUTOFF
INV_CUTOFF_SQ = 1.0 / CUTOFF_SQ
TWO_OVER_CUTOFF = 2.0 / CUTOFF
INV_CUTOFF_SR = 1.0 / CUTOFF_SR
KEHALF = 7.199822675975274         # kehalf_ase with unit factors == 1.0
SPLIT_DISTANCE = (CUTOFF_SR is not None) and (CUTOFF != CUTOFF_SR)


def _round_up(a, b):
    return ((a + b - 1) // b) * b


def _cdiv(a, b):
    return -(-a // b)


def _electrostatics_kernel(qi_ref, qj_ref, d_ref, idx_ref, o_ref, acc_ref):
    # qi_ref/qj_ref/d_ref: (1, PBLK) f32   gathered charges / pair distances
    # idx_ref:             (1, PBLK) i32   scatter target atom per pair (row!)
    # o_ref:               (1, 1, NBLK) f32  per-atom energy (one core-split, one N-block)
    # acc_ref:             (1, NBLK) f32   VMEM accumulator (resident over p)
    nblk = o_ref.shape[-1]
    p_id = pl.program_id(2)

    @pl.when(p_id == 0)
    def _():
        acc_ref[...] = jnp.zeros_like(acc_ref)

    d = d_ref[...]                     # (1, PBLK)
    q_i = qi_ref[...]
    q_j = qj_ref[...]

    # shielded distance via a single rsqrt (EUP): d_sh = (d^2+1) * rsqrt(d^2+1)
    d2p1 = d * d + 1.0
    inv_dsh = jax.lax.rsqrt(d2p1)      # 1 / sqrt(d^2 + 1)
    d_sh = d2p1 * inv_dsh              # sqrt(d^2 + 1)

    # Poly6 switch-off at the short-range cutoff (Horner form)
    x = d * INV_CUTOFF_SR
    x3 = x * x * x
    poly6 = x3 * (x * (15.0 - 6.0 * x) - 10.0) + 1.0
    sw_off = jnp.where(x < 1.0, poly6, 0.0)
    sw_on = 1.0 - sw_off

    if SPLIT_DISTANCE:
        e_ord = 1.0 / d + d * INV_CUTOFF_SQ - TWO_OVER_CUTOFF
        e_shl = inv_dsh + d_sh * INV_CUTOFF_SQ - TWO_OVER_CUTOFF
    else:
        e_ord = 1.0 / d
        e_shl = inv_dsh

    e_pair = KEHALF * q_i * q_j * (sw_off * e_shl + sw_on * e_ord)   # (1, PBLK)
    # also zeroes padded pairs (padded d > CUTOFF)
    e_pair = jnp.where(d <= CUTOFF, e_pair, 0.0)

    # scatter_sum over idx_i as an MXU matmul with trans-B contraction:
    #   oh[n, p] = 1.0 iff idx_i[p] == (n_base + n)
    #   acc(1, NBLK) += e_pair(1, PBLK) . oh(NBLK, PBLK)^T
    n_base = pl.program_id(1) * nblk
    idx_rel = idx_ref[...] - n_base                                   # (1, PBLK)
    n_ids = jax.lax.broadcasted_iota(jnp.int32, (nblk, 1), 0)         # (NBLK, 1)
    oh = (n_ids == idx_rel).astype(jnp.float32)                       # (NBLK, PBLK)

    acc_ref[...] += jax.lax.dot_general(
        e_pair, oh,
        dimension_numbers=(((1,), (1,)), ((), ())),
        preferred_element_type=jnp.float32)                           # (1, NBLK)

    @pl.when(p_id == pl.num_programs(2) - 1)
    def _():
        o_ref[...] = acc_ref[...].reshape(o_ref.shape)


def pc_dipole_damped_electrostatics(atomic_charges, atomic_dipoles,
                                    distances, idx_i, idx_j,
                                    *, pblk_max=1024, nblk=256, core_splits=2):
    """atomic_charges/atomic_dipoles: (N,) f32; distances/idx_i/idx_j: (P,)."""
    del atomic_dipoles  # gathered but unused in the reference energy expression
    N = atomic_charges.shape[0]
    P = distances.shape[0]

    q = atomic_charges.astype(jnp.float32)
    idx_i = idx_i.astype(jnp.int32)
    idx_j = idx_j.astype(jnp.int32)

    # tiny-vector gathers done wrapper-side (essentially free in XLA)
    q_i = q[idx_i]
    q_j = q[idx_j]
    d = distances.astype(jnp.float32)

    # atom axis: lane-dense blocks, clamped to what N actually needs
    nblk = min(nblk, _round_up(max(N, 1), 128))
    n_pad = _round_up(max(N, 1), nblk)
    n_blocks = n_pad // nblk

    # pair axis: tile, then split across `core_splits` parallel grid slices
    pblk = min(pblk_max, _round_up(max(P, 1), 128))
    p_blocks_per_core = _cdiv(_cdiv(max(P, 1), pblk), core_splits)
    p_pad = core_splits * p_blocks_per_core * pblk
    pad_p = p_pad - P

    # padded pairs MUST use d > CUTOFF (not 0) so 1/d stays finite and the
    # cutoff mask zeroes their contribution exactly.
    d_p = jnp.pad(d, (0, pad_p), constant_values=CUTOFF + 1.0)
    qi_p = jnp.pad(q_i, (0, pad_p))
    qj_p = jnp.pad(q_j, (0, pad_p))
    ii_p = jnp.pad(idx_i, (0, pad_p))

    grid = (core_splits, n_blocks, p_blocks_per_core)

    def pair_map(c, n, p, _ppc=p_blocks_per_core):
        return (0, c * _ppc + p)

    cost = pl.CostEstimate(
        flops=int(2 * p_pad * n_pad + 30 * p_pad * n_blocks),
        transcendentals=int(2 * p_pad * n_blocks),
        bytes_accessed=int(16 * p_pad * n_blocks + 4 * n_pad * core_splits),
    )

    out = pl.pallas_call(
        _electrostatics_kernel,
        out_shape=jax.ShapeDtypeStruct((core_splits, 1, n_pad), jnp.float32),
        grid=grid,
        in_specs=[
            pl.BlockSpec((1, pblk), pair_map),   # q_i
            pl.BlockSpec((1, pblk), pair_map),   # q_j
            pl.BlockSpec((1, pblk), pair_map),   # d
            pl.BlockSpec((1, pblk), pair_map),   # idx_i (dense row, contiguous DMA)
        ],
        out_specs=pl.BlockSpec((1, 1, nblk), lambda c, n, p: (c, 0, n)),
        scratch_shapes=[pltpu.VMEM((1, nblk), jnp.float32)],
        compiler_params=pltpu.CompilerParams(
            dimension_semantics=("parallel", "parallel", "arbitrary")),
        cost_estimate=cost,
    )(qi_p.reshape(1, p_pad), qj_p.reshape(1, p_pad),
      d_p.reshape(1, p_pad), ii_p.reshape(1, p_pad))

    # combine per-core-split partial sums, drop atom padding
    return jnp.sum(out[:, 0, :], axis=0)[:N]


def _reference(atomic_charges, atomic_dipoles, distances, idx_i, idx_j):
    """Pure-JAX reference for correctness check."""
    del atomic_dipoles
    q_i = atomic_charges[idx_i]
    q_j = atomic_charges[idx_j]
    d = distances
    d_sh = jnp.sqrt(d * d + 1.0)
    x = d / CUTOFF_SR
    poly6 = 1.0 - 6.0 * x ** 5 + 15.0 * x ** 4 - 10.0 * x ** 3
    sw_off = jnp.where(x < 1.0, poly6, 0.0)
    sw_on = 1.0 - sw_off
    if SPLIT_DISTANCE:
        e_ord = 1.0 / d + d / CUTOFF_SQ - 2.0 / CUTOFF
        e_shl = 1.0 / d_sh + d_sh / CUTOFF_SQ - 2.0 / CUTOFF
    else:
        e_ord = 1.0 / d
        e_shl = 1.0 / d_sh
    e = KEHALF * q_i * q_j * (sw_off * e_shl + sw_on * e_ord)
    e = jnp.where(d <= CUTOFF, e, 0.0)
    return jax.ops.segment_sum(e, idx_i, num_segments=atomic_charges.shape[0])


if __name__ == "__main__":
    key = jax.random.PRNGKey(0)
    k1, k2, k3, k4, k5 = jax.random.split(key, 5)

    N = 16   # number of atoms
    P = 64   # number of atom pairs

    atomic_charges = jax.random.normal(k1, (N,), dtype=jnp.float32)
    atomic_dipoles = jax.random.normal(k2, (N,), dtype=jnp.float32)
    distances = jax.random.uniform(k3, (P,), dtype=jnp.float32,
                                   minval=0.5, maxval=10.0)  # some beyond cutoff
    idx_i = jax.random.randint(k4, (P,), 0, N, dtype=jnp.int32)
    idx_j = jax.random.randint(k5, (P,), 0, N, dtype=jnp.int32)

    out = pc_dipole_damped_electrostatics(
        atomic_charges, atomic_dipoles, distances, idx_i, idx_j)
    out = jax.block_until_ready(out)

    ref = _reference(atomic_charges, atomic_dipoles, distances, idx_i, idx_j)
    assert out.shape == (N,)
    assert jnp.allclose(out, ref, atol=1e-4, rtol=1e-4), (out, ref)

    print("KERNEL_OK")
</pallas_src>

<mosaic_0001>
module attributes {stable_mosaic.version = 11 : i64} {
  func.func @_electrostatics_kernel(%arg0: i32, %arg1: i32, %arg2: i32, %arg3: memref<1x128xf32, #tpu.memory_space<vmem>>, %arg4: memref<1x128xf32, #tpu.memory_space<vmem>>, %arg5: memref<1x128xf32, #tpu.memory_space<vmem>>, %arg6: memref<1x128xi32, #tpu.memory_space<vmem>>, %arg7: memref<1x1x128xf32, #tpu.memory_space<vmem>>, %arg8: memref<1x128xf32, #tpu.memory_space<vmem>>) attributes {dimension_semantics = [#tpu.dimension_semantics<parallel>, #tpu.dimension_semantics<parallel>, #tpu.dimension_semantics<arbitrary>], iteration_bounds = array<i64: 2, 1, 1>, scalar_prefetch = 0 : i64, scratch_operands = 1 : i64, tpu.core_type = #tpu.core_type<tc>, window_params = [{transform_indices = @transform_0, window_bounds = array<i64: 1, 128>}, {transform_indices = @transform_1, window_bounds = array<i64: 1, 128>}, {transform_indices = @transform_2, window_bounds = array<i64: 1, 128>}, {transform_indices = @transform_3, window_bounds = array<i64: 1, 128>}, {transform_indices = @transform_4, window_bounds = array<i64: 1, 1, 128>}]} {
    %c0_i32 = arith.constant 0 : i32
    %0 = arith.cmpi eq, %arg2, %c0_i32 : i32
    %1 = arith.extui %0 : i1 to i32
    %c0_i32_0 = arith.constant 0 : i32
    %2 = arith.cmpi ne, %1, %c0_i32_0 : i32
    scf.if %2 {
      %cst_31 = arith.constant 0.000000e+00 : f32
      %71 = vector.broadcast %cst_31 : f32 to vector<1x128xf32>
      %c0_32 = arith.constant 0 : index
      %c0_33 = arith.constant 0 : index
      %72 = vector.load %arg8[%c0_32, %c0_33] : memref<1x128xf32, #tpu.memory_space<vmem>>, vector<1x128xf32>
      tpu.vector_store %arg8[%c0_32, %c0_33], %71 {strides = array<i32>} : memref<1x128xf32, #tpu.memory_space<vmem>>, vector<1x128xf32>,
    } else {
    }
    %c0 = arith.constant 0 : index
    %c0_1 = arith.constant 0 : index
    %3 = vector.load %arg5[%c0, %c0_1] : memref<1x128xf32, #tpu.memory_space<vmem>>, vector<1x128xf32>
    %c0_2 = arith.constant 0 : index
    %c0_3 = arith.constant 0 : index
    %4 = vector.load %arg3[%c0_2, %c0_3] : memref<1x128xf32, #tpu.memory_space<vmem>>, vector<1x128xf32>
    %c0_4 = arith.constant 0 : index
    %c0_5 = arith.constant 0 : index
    %5 = vector.load %arg4[%c0_4, %c0_5] : memref<1x128xf32, #tpu.memory_space<vmem>>, vector<1x128xf32>
    %6 = arith.mulf %3, %3 : vector<1x128xf32>
    %cst = arith.constant 1.000000e+00 : f32
    %7 = vector.broadcast %cst : f32 to vector<1x128xf32>
    %8 = arith.addf %6, %7 : vector<1x128xf32>
    %9 = math.rsqrt %8 : vector<1x128xf32>
    %10 = arith.mulf %8, %9 : vector<1x128xf32>
    %cst_6 = arith.constant 2.500000e-01 : f32
    %11 = vector.broadcast %cst_6 : f32 to vector<1x128xf32>
    %12 = arith.mulf %3, %11 : vector<1x128xf32>
    %13 = arith.mulf %12, %12 : vector<1x128xf32>
    %14 = arith.mulf %13, %12 : vector<1x128xf32>
    %cst_7 = arith.constant 6.000000e+00 : f32
    %15 = vector.broadcast %cst_7 : f32 to vector<1x128xf32>
    %16 = arith.mulf %15, %12 : vector<1x128xf32>
    %cst_8 = arith.constant 1.500000e+01 : f32
    %17 = vector.broadcast %cst_8 : f32 to vector<1x128xf32>
    %18 = arith.subf %17, %16 : vector<1x128xf32>
    %19 = arith.mulf %12, %18 : vector<1x128xf32>
    %cst_9 = arith.constant 1.000000e+01 : f32
    %20 = vector.broadcast %cst_9 : f32 to vector<1x128xf32>
    %21 = arith.subf %19, %20 : vector<1x128xf32>
    %22 = arith.mulf %14, %21 : vector<1x128xf32>
    %cst_10 = arith.constant 1.000000e+00 : f32
    %23 = vector.broadcast %cst_10 : f32 to vector<1x128xf32>
    %24 = arith.addf %22, %23 : vector<1x128xf32>
    %cst_11 = arith.constant 1.000000e+00 : f32
    %25 = vector.broadcast %cst_11 : f32 to vector<1x128xf32>
    %26 = arith.cmpf olt, %12, %25 : vector<1x128xf32>
    %cst_12 = arith.constant 0.000000e+00 : f32
    %27 = vector.broadcast %cst_12 : f32 to vector<1x128xf32>
    %28 = arith.select %26, %24, %27 : vector<1x128xi1>, vector<1x128xf32>
    %cst_13 = arith.constant 1.000000e+00 : f32
    %29 = vector.broadcast %cst_13 : f32 to vector<1x128xf32>
    %30 = arith.subf %29, %28 : vector<1x128xf32>
    %cst_14 = arith.constant 1.000000e+00 : f32
    %31 = vector.broadcast %cst_14 : f32 to vector<1x128xf32>
    %32 = arith.divf %31, %3 : vector<1x128xf32>
    %cst_15 = arith.constant 1.562500e-02 : f32
    %33 = vector.broadcast %cst_15 : f32 to vector<1x128xf32>
    %34 = arith.mulf %3, %33 : vector<1x128xf32>
    %35 = arith.addf %32, %34 : vector<1x128xf32>
    %cst_16 = arith.constant 2.500000e-01 : f32
    %36 = vector.broadcast %cst_16 : f32 to vector<1x128xf32>
    %37 = arith.subf %35, %36 : vector<1x128xf32>
    %cst_17 = arith.constant 1.562500e-02 : f32
    %38 = vector.broadcast %cst_17 : f32 to vector<1x128xf32>
    %39 = arith.mulf %10, %38 : vector<1x128xf32>
    %40 = arith.addf %9, %39 : vector<1x128xf32>
    %cst_18 = arith.constant 2.500000e-01 : f32
    %41 = vector.broadcast %cst_18 : f32 to vector<1x128xf32>
    %42 = arith.subf %40, %41 : vector<1x128xf32>
    %cst_19 = arith.constant 7.1998229 : f32
    %43 = vector.broadcast %cst_19 : f32 to vector<1x128xf32>
    %44 = arith.mulf %43, %4 : vector<1x128xf32>
    %45 = arith.mulf %44, %5 : vector<1x128xf32>
    %46 = arith.mulf %28, %42 : vector<1x128xf32>
    %47 = arith.mulf %30, %37 : vector<1x128xf32>
    %48 = arith.addf %46, %47 : vector<1x128xf32>
    %49 = arith.mulf %45, %48 : vector<1x128xf32>
    %cst_20 = arith.constant 8.000000e+00 : f32
    %50 = vector.broadcast %cst_20 : f32 to vector<1x128xf32>
    %51 = arith.cmpf ole, %3, %50 : vector<1x128xf32>
    %cst_21 = arith.constant 0.000000e+00 : f32
    %52 = vector.broadcast %cst_21 : f32 to vector<1x128xf32>
    %53 = arith.select %51, %49, %52 : vector<1x128xi1>, vector<1x128xf32>
    %c128_i32 = arith.constant 128 : i32
    %54 = arith.muli %arg1, %c128_i32 : i32
    %c0_22 = arith.constant 0 : index
    %c0_23 = arith.constant 0 : index
    %55 = vector.load %arg6[%c0_22, %c0_23] : memref<1x128xi32, #tpu.memory_space<vmem>>, vector<1x128xi32>
    %56 = vector.broadcast %54 : i32 to vector<1x128xi32>
    %57 = arith.subi %55, %56 : vector<1x128xi32>
    %58 = tpu.iota {dimensions = array<i32: 0>} : vector<128x1xi32>
    %59 = vector.broadcast %58 : vector<128x1xi32> to vector<128x128xi32>
    %60 = vector.broadcast %57 : vector<1x128xi32> to vector<128x128xi32>
    %61 = arith.cmpi eq, %59, %60 : vector<128x128xi32>
    %62 = arith.extui %61 : vector<128x128xi1> to vector<128x128xi32>
    %63 = arith.sitofp %62 : vector<128x128xi32> to vector<128x128xf32>
    %c0_24 = arith.constant 0 : index
    %c0_25 = arith.constant 0 : index
    %64 = vector.load %arg8[%c0_24, %c0_25] : memref<1x128xf32, #tpu.memory_space<vmem>>, vector<1x128xf32>
    %cst_26 = arith.constant dense<0.000000e+00> : vector<1x128xf32>
    %65 = tpu.matmul %53, %63, %cst_26 {dimension_numbers = #tpu.dot_dimension_numbers<[1], [1], [0], [0], [0, 0, 1, 0], [], []>} : vector<1x128xf32>, vector<128x128xf32>, vector<1x128xf32> -> vector<1x128xf32>
    %66 = arith.addf %64, %65 : vector<1x128xf32>
    %c0_27 = arith.constant 0 : index
    %c0_28 = arith.constant 0 : index
    %67 = vector.load %arg8[%c0_27, %c0_28] : memref<1x128xf32, #tpu.memory_space<vmem>>, vector<1x128xf32>
    tpu.vector_store %arg8[%c0_27, %c0_28], %66 {strides = array<i32>} : memref<1x128xf32, #tpu.memory_space<vmem>>, vector<1x128xf32>,
    %c0_i32_29 = arith.constant 0 : i32
    %68 = arith.cmpi eq, %arg2, %c0_i32_29 : i32
    %69 = arith.extui %68 : i1 to i32
    %c0_i32_30 = arith.constant 0 : i32
    %70 = arith.cmpi ne, %69, %c0_i32_30 : i32
    scf.if %70 {
      %c0_31 = arith.constant 0 : index
      %c0_32 = arith.constant 0 : index
      %71 = vector.load %arg8[%c0_31, %c0_32] : memref<1x128xf32, #tpu.memory_space<vmem>>, vector<1x128xf32>
      %72 = vector.shape_cast %71 : vector<1x128xf32> to vector<1x1x128xf32>
      %c0_33 = arith.constant 0 : index
      %c0_34 = arith.constant 0 : index
      %c0_35 = arith.constant 0 : index
      %73 = vector.load %arg7[%c0_33, %c0_34, %c0_35] : memref<1x1x128xf32, #tpu.memory_space<vmem>>, vector<1x1x128xf32>
      tpu.vector_store %arg7[%c0_33, %c0_34, %c0_35], %72 {strides = array<i32>} : memref<1x1x128xf32, #tpu.memory_space<vmem>>, vector<1x1x128xf32>,
    } else {
    }
    return
  }
  func.func @transform_0(%arg0: i32, %arg1: i32, %arg2: i32) -> (i32, i32) {
    %c1_i32 = arith.constant 1 : i32
    %0 = arith.muli %arg0, %c1_i32 : i32
    %1 = arith.addi %0, %arg2 : i32
    %c0_i32 = arith.constant 0 : i32
    %c0_i32_0 = arith.constant 0 : i32
    return %c0_i32, %1 : i32, i32
  }
  func.func @transform_1(%arg0: i32, %arg1: i32, %arg2: i32) -> (i32, i32) {
    %c1_i32 = arith.constant 1 : i32
    %0 = arith.muli %arg0, %c1_i32 : i32
    %1 = arith.addi %0, %arg2 : i32
    %c0_i32 = arith.constant 0 : i32
    %c0_i32_0 = arith.constant 0 : i32
    return %c0_i32, %1 : i32, i32
  }
  func.func @transform_2(%arg0: i32, %arg1: i32, %arg2: i32) -> (i32, i32) {
    %c1_i32 = arith.constant 1 : i32
    %0 = arith.muli %arg0, %c1_i32 : i32
    %1 = arith.addi %0, %arg2 : i32
    %c0_i32 = arith.constant 0 : i32
    %c0_i32_0 = arith.constant 0 : i32
    return %c0_i32, %1 : i32, i32
  }
  func.func @transform_3(%arg0: i32, %arg1: i32, %arg2: i32) -> (i32, i32) {
    %c1_i32 = arith.constant 1 : i32
    %0 = arith.muli %arg0, %c1_i32 : i32
    %1 = arith.addi %0, %arg2 : i32
    %c0_i32 = arith.constant 0 : i32
    %c0_i32_0 = arith.constant 0 : i32
    return %c0_i32, %1 : i32, i32
  }
  func.func @transform_4(%arg0: i32, %arg1: i32, %arg2: i32) -> (i32, i32, i32) {
    %c0_i32 = arith.constant 0 : i32
    %c0_i32_0 = arith.constant 0 : i32
    return %arg0, %c0_i32, %arg1 : i32, i32, i32
  }
}

</mosaic_0001>

<bundles_post_ra>
// kernel: tpu_custom_call.1
= control target key start
LH: loop header
LB: loop body
LE: loop exit
PB: predicated region body
PF: predicated region fallthrough
CT: control target
= control target key end

     0   :  { %9 = vsyncpa [#allocation4], 0  ;;  %s1193_s0 = inlined_call_operand.hbm [shape: f32[1,256], index: 0, kind: input, shape index: {}]   ;;  %s1194_s1 = inlined_call_operand.vmem [shape: f32[1,256], index: 1, kind: input, shape index: {}]   ;;  %s1195_s2 = inlined_call_operand.vmem [shape: f32[1,256], index: 2, kind: input, shape index: {}]   ;;  %s1196_s3 = inlined_call_operand.vmem [shape: s32[1,256], index: 3, kind: input, shape index: {}]   ;;  %s1197_s4 = inlined_call_operand.hbm [shape: f32[2,1,128], index: 4, kind: output, shape index: {}]  }
   0x1   :  { %11 = vsyncpa [#allocation4 + $0x1], 0 }
   0x2   :  { %12 = vsyncpa [#allocation5], 0 }
   0x3   :  { %14 = vsyncpa [#allocation5 + $0x1], 0  ;;  %s942_s15 = smov 0   ;;  %s944_s16 = smov 0  }
   0x4   :  { %s946_s17 = smov 0   ;;  %s948_s18 = smov 0  }
   0x5   :  { %s950_s19 = smov 0   ;;  %s952_s20 = smov 0  }
   0x6 LB: > { %s605_s21 = sadd.s32 4294967295, %s909_s20   ;;  %s606_s22 = sadd.s32 4294967294, %s909_s20   ;;  %s909_s20 = sphi %s952_s20, %s20_s20   ;;  %s905_s19 = sphi %s950_s19, %s1213_s19   ;;  %s901_s18 = sphi %s948_s18, %s1212_s18   ;;  %s897_s17 = sphi %s946_s17, %s1211_s17   ;;  %s893_s16 = sphi %s944_s16, %s1210_s16   ;;  %s889_s15 = sphi %s942_s15, %s1209_s15  }
   0x7   : > { %s39_s23 = sadd.s32 1, %s905_s19  ;;  %s48_s24 = sadd.s32 1, %s897_s17 }
   0x8   : > { %p41_p0 = scmp.ge.s32.totalorder %s39_s23, 2  ;;  %p55_p1 = scmp.ne.s32.totalorder %s897_s17, %s893_s16 }
   0x9   : > { %p56_p2 = scmp.eq.s32.totalorder %s909_s20, 0  ;;  %p61_p3 = scmp.ne.s32.totalorder %s893_s16, %s889_s15 }
   0xa   : > { %s1215_s23 = smov (%p41_p0, %s39_s23), 0  ;;  %p62_p5 = scmp.eq.s32.totalorder %s605_s21, 0 }
   0xb   : > { %p983_p4 = por %p56_p2, %p55_p1  ;;  %s45_s26 = ssub.s32 %s905_s19, %s1215_s23 }
   0xc   : > { %p171_p6 = scmp.eq.s32.totalorder %s605_s21, 1  ;;  %p46_p7 = scmp.eq.s32.totalorder %s45_s26, 0 }
   0xd   : > { %p989_p8 = por %p62_p5, %p61_p3  ;;  %p177_p10 = scmp.eq.s32.totalorder %s606_s22, 1 }
   0xe   : > { %p993_p9 = por %p171_p6, %p55_p1  ;;  %p739_p13 = scmp.lt.s32.totalorder %s909_s20, 2 }
   0xf   : > { %s998_s29 = scalar_select %p46_p7, %s897_s17, %s48_s24  }
  0x10   : > { %s1201_s28 = scalar_select %p993_p9, 1, 0 }
  0x11   : > { %p1000_p11 = por %p177_p10, %p61_p3  ;;  %s197_s5 = sand.u32 1, %s897_s17  }
  0x12   : > { %s609_s6 = sshll.u32 %s905_s19, 4  ;;  %s200_s7 = scalar_lea.vmem [#allocation3], %s197_s5 }
  0x13   : > { %s1202_s30 = scalar_select %p1000_p11, 1, 0 }
  0x14   : > { %s208_s8 = sshll.u32 %s200_s7, 4  ;;  %s1011_s11 = scalar_lea.hbm %s1193_s0, %s609_s6  ;;  %s1013_s8 = int_to_ptr.vmem [resolvable:$true] %s208_s8 }
  0x15   : > { %p1017_p0 = pnand %p739_p13, %p983_p4  ;;  %s198_s13 = scalar_lea.sflag [#allocation4], %s197_s5 }
  0x16   : > { %s797_s14 = scalar_lea.hbm %s1011_s11, 16  ;;  %s802_s24 = scalar_lea.hbm %s1193_s0, 32 }
  0x17   : > { %p798_p3 = scmp.ne.s32.totalorder %s1011_s11, %s797_s14  ;;  %p799_p5 = pneg %p1017_p0 }
  0x18   : > { %p803_p4 = scmp.lt.u32.totalorder %s1011_s11, %s1193_s0  ;;  %p804_p10 = scmp.lt.u32.totalorder %s802_s24, %s797_s14 }
  0x19   : > { %p800_p6 = pnand %p799_p5, %p798_p3  ;;  %p806_p12 = scmp.lt.u32.totalorder %s797_s14, %s1011_s11 }
  0x1a   : > { %p805_p13 = por %p804_p10, %p803_p4 }
  0x1b   : > { %p801_p7 = pneg %p800_p6 }
  0x1c   : > { %p807_p1 = por %p806_p12, %p805_p13 }
  0x1e   : > { %p808_p2 = pnand %p807_p1, %p801_p7 }
  0x20   : > { %811 = shalt.err (!%p808_p2)
}
  0x21   : > { %s812_s5 = scalar_lea.vmem %s1013_s8, 16  ;;  %s911_s6 = smov [#allocation3]  }
  0x22   : > { %p813_p3 = scmp.ne.s32.totalorder %s1013_s8, %s812_s5  ;;  %s817_s7 = sshll.u32 %s911_s6, 4  ;;  %s818_s7 = int_to_ptr.vmem [resolvable:$false] %s817_s7 }
  0x23   : > { %s819_s9 = scalar_lea.vmem %s818_s7, 32  ;;  %p820_p9 = scmp.lt.s32.totalorder %s1013_s8, %s818_s7 }
  0x24   : > { %p815_p6 = pnand %p813_p3, %p799_p5  ;;  %p821_p4 = scmp.lt.s32.totalorder %s819_s9, %s812_s5 }
  0x26   : > { %p816_p11 = pneg %p815_p6  ;;  %p822_p10 = por %p821_p4, %p820_p9 }
  0x28   : > { %p823_p12 = pnand %p822_p10, %p816_p11 }
  0x2a   : > { %826 = shalt.err (!%p823_p12)
}
  0x2b   : > { %734 = dma.hbm_to_vmem [thread:$0]  (!%p1017_p0), %s1011_s11, 16, %s1013_s8, %s198_s13  }
  0x2c   : > { %p1204_p1 = scmp.lt.s32.totalorder %s909_s20, 3  ;;  %p1205_p2 = scmp.ge.s32.totalorder %s909_s20, 1 }
  0x2e   : > { %p238_p5 = pnand %p1205_p2, %p1204_p1 }
  0x2f   : > { %s1053_s10 = sand.u32 (!%p238_p5), 1, %s893_s16  }
  0x30   : > { %241 = sbr.rel (%p238_p5) target bundleno = 363 (0x16b), region = 36  ;;  %s244_s14 = scalar_lea.sflag (!%p238_p5), [#allocation4], %s1053_s10 }
  0x31   : > { %s246_s21 = scalar_lea.vmem (!%p238_p5), [#allocation3], %s1053_s10 }
  0x37   : > { %880 = dma.done.wait (%p989_p8), %s244_s14, 16  }
  0x38   : > { %882 = vsyncadd (%p989_p8), %s244_s14, 4294967280  ;;  %p283_p9 = scmp.lt.s32.totalorder %s901_s18, 1  ;;  %v341_v0 = vlaneseq  ;;  %v912_v1 = vmov 0.0|0.0   ;;  %v913_v2 = vmov 0.0   ;;  %vm914_vm0 = vmmov 0   ;;  %s648_s6 = sshll.u32 %s901_s18, 4 }
  0x39   : > { %703 = vmatprep.subr.bf16.mxu0 %v912_v1  ;;  %301 = vst [vmem:[#allocation2] sm:$0x1] %v913_v2  ;;  %700 = vmatprep.mubr.msk.f32.mxu0 %vm914_vm0, %v913_v2  ;;  %v915_v8 = vmov 1.0|1.0   ;;  %v303_v44 = vld [vmem:[%s246_s21] sm:$0x1] }
  0x3a   : > { %s1064_s8 = scalar_select %p283_p9, %s901_s18, 1  ;;  %v1066_v3 = vshrl.u32 %v341_v0, 7  ;;  %v329_v45 = vmul.f32 7.199823, %v303_v44 }
  0x3b   : > { %s280_s7 = scalar_lea.vmem [#allocation6], %s1053_s10  ;;  %s489_s11 = scalar_lea.sflag [#allocation5], %s1053_s10 }
  0x3c   : > { %s295_s27 = scalar_lea.vmem %s1196_s3, %s1064_s8  ;;  %v343_v4 = vadd.s32 8, %v1066_v3  ;;  %v344_v6 = vadd.s32 16, %v1066_v3  ;;  %v345_v7 = vadd.s32 24, %v1066_v3  ;;  %v346_v9 = vadd.s32 32, %v1066_v3  ;;  %s290_s24 = scalar_lea.vmem %s1195_s2, %s1064_s8 }
  0x3d   : > { %v1073_v5 = vld [vmem:[%s295_s27] ss:$0 sm:$0xff]  ;;  %v347_v10 = vadd.s32 40, %v1066_v3  ;;  %v348_v12 = vadd.s32 48, %v1066_v3  ;;  %v349_v13 = vadd.s32 56, %v1066_v3  ;;  %v350_v18 = vadd.s32 64, %v1066_v3  ;;  %s285_s5 = scalar_lea.vmem %s1194_s1, %s1064_s8  ;;  %s1144_s8 = scalar_lea.hbm %s1197_s4, %s648_s6 }
  0x3e   : > { %vm362_vm1 = vcmp.eq.s32.totalorder %v1066_v3, %v1073_v5  ;;  %vm363_vm2 = vcmp.eq.s32.totalorder %v343_v4, %v1073_v5  ;;  %vm364_vm4 = vcmp.eq.s32.totalorder %v344_v6, %v1073_v5  ;;  %vm365_vm5 = vcmp.eq.s32.totalorder %v345_v7, %v1073_v5  ;;  %v1094_v11 = vld [vmem:[%s290_s24] sm:$0x1]  ;;  %s502_s9 = sshll.u32 %s280_s7, 4  ;;  %p1206_p11 = scmp.ne.s32.totalorder %s1201_s28, 0  ;;  %s1146_s9 = int_to_ptr.vmem [resolvable:$true] %s502_s9 }
  0x3f   : > { %vm704_vm3 = vmpackc.low %vm363_vm2, %vm362_vm1  ;;  %vm366_vm7 = vcmp.eq.s32.totalorder %v346_v9, %v1073_v5  ;;  %vm367_vm8 = vcmp.eq.s32.totalorder %v347_v10, %v1073_v5  ;;  %v305_v14 = vmul.f32 %v1094_v11, %v1094_v11  ;;  %v309_v15 = vmul.f32 0.25, %v1094_v11  ;;  %v304_v48 = vld [vmem:[%s285_s5] sm:$0x1]  ;;  %s827_s12 = scalar_lea.vmem %s1146_s9, 16  ;;  %s916_s18 = smov [#allocation6]  }
  0x40   : > { %705 = vmatpush3.bf16.xpose.msk.msra.mxu0 %vm704_vm3, %v915_v8  ;;  %vm707_vm6 = vmpackc.low %vm365_vm5, %vm364_vm4  ;;  %vm368_vm10 = vcmp.eq.s32.totalorder %v348_v12, %v1073_v5  ;;  %vm369_vm11 = vcmp.eq.s32.totalorder %v349_v13, %v1073_v5  ;;  %v351_v19 = vadd.s32 72, %v1066_v3  ;;  %vm370_vm13 = vcmp.eq.s32.totalorder %v350_v18, %v1073_v5  ;;  %v410_v52 = vld [vmem:[#allocation2] sm:$0x1]  ;;  %p828_p8 = scmp.ne.s32.totalorder %s1146_s9, %s827_s12  ;;  %s831_s27 = sshll.u32 %s916_s18, 4  ;;  %s832_s27 = int_to_ptr.vmem [resolvable:$false] %s831_s27 }
  0x41   : > { %706 = vmatprep.subr.bf16.mxu0 %v912_v1  ;;  %vm710_vm9 = vmpackc.low %vm367_vm8, %vm366_vm7  ;;  %v306_v16 = vadd.f32 1.0, %v305_v14  ;;  %v312_v17 = vmul.f32 6.0, %v309_v15  ;;  %v310_v21 = vmul.f32 %v309_v15, %v309_v15  ;;  %v352_v23 = vadd.s32 80, %v1066_v3  ;;  %s833_s13 = scalar_lea.vmem %s832_s27, 32  ;;  %p834_p13 = scmp.lt.s32.totalorder %s1146_s9, %s832_s27 }
  0x42   : > { %vm713_vm12 = vmpackc.low %vm369_vm11, %vm368_vm10  ;;  %vm371_vm14 = vcmp.eq.s32.totalorder %v351_v19, %v1073_v5  ;;  %v353_v24 = vadd.s32 88, %v1066_v3  ;;  %v354_v30 = vadd.s32 96, %v1066_v3  ;;  %v355_v31 = vadd.s32 104, %v1066_v3  ;;  %p829_p0 = pnand %p828_p8, %p1206_p11  ;;  %p835_p3 = scmp.lt.s32.totalorder %s833_s13, %s827_s12 }
  0x43   : > { %793 = vrsqrt.f32 %v306_v16  ;;  %v313_v20 = vsub.f32 15.0, %v312_v17  ;;  %vm716_vm15 = vmpackc.low %vm371_vm14, %vm370_vm13  ;;  %v311_v26 = vmul.f32 %v310_v21, %v309_v15  ;;  %vm372_vm0 = vcmp.eq.s32.totalorder %v352_v23, %v1073_v5 }
  0x44   : > { %795 = vrcp.f32 %v1094_v11  ;;  %vm373_vm1 = vcmp.eq.s32.totalorder %v353_v24, %v1073_v5  ;;  %v323_v32 = vmul.f32 0.015625, %v1094_v11  ;;  %vm318_vm3 = vcmp.lt.f32.partialorder %v309_v15, 1.0  ;;  %p830_p7 = pneg %p829_p0  ;;  %p836_p6 = por %p835_p3, %p834_p13 }
  0x45   : > { %v314_v22 = vmul.f32 %v313_v20, %v309_v15  ;;  %vm719_vm2 = vmpackc.low %vm373_vm1, %vm372_vm0  ;;  %vm374_vm4 = vcmp.eq.s32.totalorder %v354_v30, %v1073_v5  ;;  %vm375_vm5 = vcmp.eq.s32.totalorder %v355_v31, %v1073_v5  ;;  %v356_v39 = vadd.s32 112, %v1066_v3 }
  0x46   : > { %v357_v40 = vadd.s32 120, %v1066_v3  ;;  %v330_v49 = vmul.f32 %v329_v45, %v304_v48  ;;  %vm335_vm10 = vcmp.le.f32.partialorder %v1094_v11, 8.0  ;;  %p837_p4 = pnand %p836_p6, %p830_p7 }
  0x47   : > { %v611_v27 = vadd.f32 -10.0, %v314_v22  ;;  %vm376_vm7 = vcmp.eq.s32.totalorder %v356_v39, %v1073_v5 }
  0x48   : > { %708 = vmatpush3.bf16.xpose.msk.msra.mxu0 %vm707_vm6, %v915_v8  ;;  %vm722_vm6 = vmpackc.low %vm375_vm5, %vm374_vm4  ;;  %vm377_vm8 = vcmp.eq.s32.totalorder %v357_v40, %v1073_v5 }
  0x49   : > { %709 = vmatprep.subr.bf16.mxu0 %v912_v1  ;;  %v316_v29 = vmul.f32 %v611_v27, %v311_v26 }
  0x4b   : > { %v317_v35 = vadd.f32 1.0, %v316_v29 }
  0x4d   : > { %v794_v25 = vpop.eup %793  ;;  %v319_v38 = vsel %vm318_vm3, %v317_v35, 0.0 }
  0x4e   : > { %v308_v28 = vmul.f32 %v794_v25, %v306_v16  ;;  %v796_v34 = vpop.eup %795  ;;  %v320_v41 = vsub.f32 1.0, %v319_v38 }
  0x4f   : > { %v324_v36 = vadd.f32 %v796_v34, %v323_v32 }
  0x50   : > { %711 = vmatpush3.bf16.xpose.msk.msra.mxu0 %vm710_vm9, %v915_v8  ;;  %v326_v33 = vmul.f32 0.015625, %v308_v28  ;;  %vm725_vm9 = vmpackc.low %vm377_vm8, %vm376_vm7 }
  0x51   : > { %712 = vmatprep.subr.bf16.mxu0 %v912_v1  ;;  %v612_v42 = vadd.f32 -0.25, %v324_v36 }
  0x52   : > { %v327_v37 = vadd.f32 %v794_v25, %v326_v33 }
  0x53   : > { %v332_v47 = vmul.f32 %v612_v42, %v320_v41 }
  0x54   : > { %v613_v43 = vadd.f32 -0.25, %v327_v37 }
  0x56   : > { %v331_v46 = vmul.f32 %v613_v43, %v319_v38 }
  0x58   : > { %714 = vmatpush3.bf16.xpose.msk.msra.mxu0 %vm713_vm12, %v915_v8  ;;  %v333_v50 = vadd.f32 %v332_v47, %v331_v46 }
  0x59   : > { %715 = vmatprep.subr.bf16.mxu0 %v912_v1 }
  0x5a   : > { %v334_v51 = vmul.f32 %v333_v50, %v330_v49 }
  0x60   : > { %717 = vmatpush3.bf16.xpose.msk.msra.mxu0 %vm716_vm15, %v915_v8 }
  0x61   : > { %718 = vmatprep.subr.bf16.mxu0 %v912_v1 }
  0x68   : > { %720 = vmatpush3.bf16.xpose.msk.msra.mxu0 %vm719_vm2, %v915_v8 }
  0x69   : > { %721 = vmatprep.subr.bf16.mxu0 %v912_v1 }
  0x70   : > { %723 = vmatpush3.bf16.xpose.msk.msra.mxu0 %vm722_vm6, %v915_v8 }
  0x71   : > { %724 = vmatprep.subr.bf16.mxu0 %v912_v1 }
  0x78   : > { %726 = vmatpush3.bf16.xpose.msk.msra.mxu0 %vm725_vm9, %v915_v8 }
  0x7f   : > { %701 = vmatmul.mubr.msk.f32.vlgmr.msra.gmra.mrb[0].mxu0 %vm335_vm10, %v334_v51 }
 0x152   : > { %v477_v53 = vpop.f32.mrb[0].mxu0 }
 0x153   : > { %v481_v54 = vadd.f32 %v477_v53, %v410_v52  ;;  %v702_v55 = vpop.f32.mrb[1].mxu0 }
 0x155   : > { %482 = vst [vmem:[#allocation2] sm:$0x1] %v481_v54 }
 0x15c   : > { %v486_v56 = vld [vmem:[#allocation2] sm:$0x1] }
 0x15d   : > { %487 = vst [vmem:[%s280_s7] sm:$0x1] %v486_v56 }
 0x15e   : > { %840 = shalt.err (!%p837_p4)
}
 0x15f   : > { %s841_s10 = scalar_lea.hbm %s1144_s8, 16  ;;  %s845_s25 = scalar_lea.hbm %s1197_s4, 32 }
 0x160   : > { %p842_p10 = scmp.ne.s32.totalorder %s1144_s8, %s841_s10  ;;  %p846_p2 = scmp.lt.u32.totalorder %s1144_s8, %s1197_s4 }
 0x161   : > { %p847_p5 = scmp.lt.u32.totalorder %s845_s25, %s841_s10  ;;  %p849_p8 = scmp.lt.u32.totalorder %s841_s10, %s1144_s8 }
 0x162   : > { %p843_p12 = pnand %p842_p10, %p1206_p11 }
 0x163   : > { %p848_p9 = por %p847_p5, %p846_p2 }
 0x164   : > { %p844_p1 = pneg %p843_p12 }
 0x165   : > { %p850_p0 = por %p849_p8, %p848_p9 }
 0x167   : > { %p851_p7 = pnand %p850_p0, %p844_p1 }
 0x169   : > { %854 = shalt.err (!%p851_p7)
}
 0x16a   : > { %729 = dma.vmem_to_hbm [thread:$0]  (%p1206_p11), %s1146_s9, 16, %s1144_s8, %s489_s11  }
 0x16b PF: > { %s514_s6 = sand.u32 1, %s889_s15   ;;  %p1207_p13 = scmp.ne.s32.totalorder %s1202_s30, 0 }
 0x16c   : > { %p1208_p3 = scmp.ge.s32.totalorder %s909_s20, 2  ;;  %s515_s7 = scalar_lea.sflag [#allocation5], %s514_s6 }
 0x16e   : > { %p736_p6 = pnand %p1208_p3, %p1207_p13 }
 0x170   : > { %884 = dma.done.wait (!%p736_p6), %s515_s7, 16  }
 0x171   : > { %886 = vsyncadd (!%p736_p6), %s515_s7, 4294967280  ;;  %s20_s20 = sadd.s32 1, %s909_s20   ;;  %s1209_s15 = smov %s893_s16 }
 0x172   : > { %p17_p4 = scmp.ge.s32.totalorder %s20_s20, 4   ;;  %s1210_s16 = smov %s897_s17 }
 0x173   : > { %s1211_s17 = smov %s998_s29  ;;  %s1212_s18 = smov %s905_s19 }
 0x174   : > { %s1213_s19 = smov %s1215_s23  ;;  %19 = sbr.rel (!%p17_p4) target bundleno = 6 (0x6), region = 98 }
 0x17b   :  { %519 = vsyncpa [#allocation4], 1 }
 0x17c   :  { %521 = vsyncpa [#allocation4 + $0x1], 1 }
 0x17d   :  { %522 = vsyncpa [#allocation5], 1 }
 0x17e   :  { %524 = vsyncpa [#allocation5 + $0x1], 1 }

</bundles_post_ra>
